<compile_context>
chip_gen: v6e
topology: v6e:2x2x1
jax: 0.10.0
libtpu: 0.0.40
codegen_flags: <defaults>
</compile_context>

<pallas_src>
import functools

import jax
import jax.numpy as jnp
from jax import lax
from jax.experimental import pallas as pl
from jax.experimental.pallas import tpu as pltpu

# Model constants (simplified backbone + 6 heads of 11 classes).
KH = KW = 7
STRIDE = 2
PADDING = 3
C_STEM = 64
C_FEAT = 2048
N_HEADS = 6
N_CLS = 11
N_TOT = N_HEADS * N_CLS          # 66 real logits
NP = 128                         # lane-padded fused-head width
NCB = 2                          # Cout blocks: keeps both v7x TCs busy at small B
CB = C_FEAT // NCB               # 1024 channels per block
TS_MAX = 1024                    # spatial tile upper bound (multiple of 16)

_VMEM_LIMIT = 32 * 1024 * 1024   # explicit: safe on v5e/v6e and v7x's 64 MiB


def _round_up(x, m):
    return (x + m - 1) // m * m


# --------------------------------------------------------------------------
# Pallas kernel: 1x1 proj + ReLU + GAP + fused fc-heads epilogue
# --------------------------------------------------------------------------
def _backbone_heads_kernel(h_ref, wp_ref, fcw_ref, o_ref, acc_ref, *, inv_hw):
    """Fused projection + ReLU + global-average-pool + fc-heads epilogue.

    h_ref:   (1, TS, 64)   bf16  ReLU'd stem activations (zero-padded rows)
    wp_ref:  (64, CB)      bf16  1x1-proj weight slice for this Cout block
    fcw_ref: (CB, NP)      bf16  fused fc-head weight rows for this Cout block
    o_ref:   (1, 1, 1, NP) f32   partial logits for (batch, cout-block)
    acc_ref: (8, CB)       f32   deferred-GAP accumulator (plain vreg adds)
    """
    s = pl.program_id(2)

    @pl.when(s == 0)
    def _():
        acc_ref[...] = jnp.zeros_like(acc_ref)

    x = h_ref[0]                                                    # (TS, 64)
    f = jnp.dot(x, wp_ref[...], preferred_element_type=jnp.float32)
    f = jnp.maximum(f, 0.0)                                         # (TS, CB)
    # Deferred GAP: fold TS rows onto 8 sublanes with plain vector adds
    # (no per-step cross-sublane XLU reduce, no per-step masked (1,CB) store).
    acc_ref[...] += jnp.sum(f.reshape(-1, 8, f.shape[-1]), axis=0)

    @pl.when(s == pl.num_programs(2) - 1)
    def _():
        # One cross-sublane reduce + mean scale, then the tiny fc matmul,
        # all while the pooled slice is still resident in VMEM.
        pooled = jnp.sum(acc_ref[...], axis=0, keepdims=True) * inv_hw   # (1, CB)
        part = jnp.dot(pooled.astype(jnp.bfloat16), fcw_ref[...],
                       preferred_element_type=jnp.float32)               # (1, NP)
        o_ref[0, 0] = part


def pallas_backbone_heads(h_pad, w_proj, fc_w_p, hw_true, ts):
    """(B, S_pad, 64) bf16 activations -> (B, NCB, NP) f32 partial logits."""
    B, S_pad, _ = h_pad.shape
    assert S_pad % ts == 0 and ts % 16 == 0
    ns = S_pad // ts
    grid = (B, NCB, ns)
    kernel = functools.partial(_backbone_heads_kernel,
                               inv_hw=1.0 / float(hw_true))
    flops = 2 * B * S_pad * C_STEM * C_FEAT + 2 * B * C_FEAT * NP
    bytes_accessed = (B * S_pad * C_STEM * 2 * NCB      # h streamed per Cout block
                      + C_STEM * C_FEAT * 2             # proj weight
                      + C_FEAT * NP * 2                 # fc weight
                      + B * NCB * NP * 4)               # partial logits out
    out = pl.pallas_call(
        kernel,
        out_shape=jax.ShapeDtypeStruct((B, NCB, 1, NP), jnp.float32),
        grid_spec=pltpu.PrefetchScalarGridSpec(
            num_scalar_prefetch=0,
            grid=grid,
            in_specs=[
                pl.BlockSpec((1, ts, C_STEM), lambda b, c, s: (b, s, 0)),
                pl.BlockSpec((C_STEM, CB), lambda b, c, s: (0, c)),
                pl.BlockSpec((CB, NP), lambda b, c, s: (c, 0)),
            ],
            out_specs=pl.BlockSpec((1, 1, 1, NP), lambda b, c, s: (b, c, 0, 0)),
            scratch_shapes=[pltpu.VMEM((8, CB), jnp.float32)],
        ),
        compiler_params=pltpu.CompilerParams(
            dimension_semantics=("parallel", "parallel", "arbitrary"),
            vmem_limit_bytes=_VMEM_LIMIT,
        ),
        cost_estimate=pl.CostEstimate(flops=flops, transcendentals=0,
                                      bytes_accessed=bytes_accessed),
    )(h_pad, w_proj, fc_w_p)
    return out.reshape(B, NCB, NP)


# --------------------------------------------------------------------------
# Plain-JAX glue
# --------------------------------------------------------------------------
def _stem_features(params, x):
    """7x7/2 stem conv + ReLU via XLA's native conv (no im2col HBM blow-up)."""
    y = lax.conv_general_dilated(
        x, params["stem_w"], window_strides=(STRIDE, STRIDE),
        padding=((PADDING, PADDING), (PADDING, PADDING)),
        dimension_numbers=("NCHW", "OIHW", "NCHW"))
    y = jnp.maximum(y, 0.0)                                     # (B, 64, Ho, Wo)
    B = y.shape[0]
    hw = y.shape[2] * y.shape[3]
    h = y.reshape(B, C_STEM, hw).transpose(0, 2, 1)             # (B, HW, 64)
    return h, hw


def init_params(key):
    ks = jax.random.split(key, 10)
    p = {}
    # Simplified ResNet-101 stem: Conv2d(3, 64, 7, stride=2, pad=3, bias=False)
    p["stem_w"] = jax.random.normal(ks[0], (C_STEM, 3, KH, KW), jnp.float32) * 0.05
    # 1x1 conv 64 -> 2048 stand-in for the missing residual stages.
    p["proj_w"] = jax.random.normal(ks[1], (C_FEAT, C_STEM, 1, 1), jnp.float32) * 0.05
    # Six Linear(2048, 11) heads (fc1..fc6), fused into one (2048, 66) matmul.
    ws, bs = [], []
    for h in range(N_HEADS):
        ws.append(jax.random.normal(ks[2 + h], (C_FEAT, N_CLS), jnp.float32) * 0.02)
        bs.append(jnp.full((N_CLS,), 0.01 * (h + 1), jnp.float32))
    p["fc_w"] = jnp.concatenate(ws, axis=1)   # (2048, 66)
    p["fc_b"] = jnp.concatenate(bs, axis=0)   # (66,)
    return p


def st_model_forward(params, x):
    B = x.shape[0]
    h, HW = _stem_features(params, x)                           # (B, HW, 64) f32

    # Spatial tile: large (amortises ~600-cycle per-step overhead), balanced
    # across tiles, multiple of 16 (bf16 sublane packing).  Padded rows are
    # zero so the GAP sum is unchanged; we divide by the TRUE H*W.
    n_tiles = -(-HW // TS_MAX)
    ts = _round_up(-(-HW // n_tiles), 16)
    S_pad = ts * n_tiles
    h_pad = jnp.pad(h.astype(jnp.bfloat16), ((0, 0), (0, S_pad - HW), (0, 0)))

    # Weights for the kernel (K stays 64: architecture floor, see review).
    w_proj = params["proj_w"].reshape(C_FEAT, C_STEM).T.astype(jnp.bfloat16)  # (64, 2048)
    fc_w_p = jnp.zeros((C_FEAT, NP), jnp.bfloat16)
    fc_w_p = fc_w_p.at[:, :N_TOT].set(params["fc_w"].astype(jnp.bfloat16))

    parts = pallas_backbone_heads(h_pad, w_proj, fc_w_p, HW, ts)  # (B, NCB, NP)
    # Cross-Cout-block partial sum + bias on a tiny (B, 66) array.
    logits = parts.sum(axis=1)[:, :N_TOT] + params["fc_b"]
    return tuple(logits[:, i * N_CLS:(i + 1) * N_CLS] for i in range(N_HEADS))


def st_model_forward_ref(params, x):
    """Pure-JAX f32 reference of the same simplified forward."""
    h, _ = _stem_features(params, x)
    w_proj = params["proj_w"].reshape(C_FEAT, C_STEM).T
    f = jnp.maximum(h @ w_proj, 0.0)
    pooled = f.mean(axis=1)                                      # (B, 2048)
    logits = pooled @ params["fc_w"] + params["fc_b"]
    return tuple(logits[:, i * N_CLS:(i + 1) * N_CLS] for i in range(N_HEADS))


if __name__ == "__main__":
    x = jax.random.normal(jax.random.PRNGKey(0), (2, 3, 16, 16), jnp.float32)
    params = init_params(jax.random.PRNGKey(42))

    outs = jax.block_until_ready(jax.jit(st_model_forward)(params, x))
    refs = jax.block_until_ready(jax.jit(st_model_forward_ref)(params, x))

    assert len(outs) == 6
    assert all(o.shape == (2, 11) and o.dtype == jnp.float32 for o in outs)
    for o, r in zip(outs, refs):
        assert bool(jnp.allclose(o, r, rtol=5e-2, atol=5e-2)), \
            float(jnp.max(jnp.abs(o - r)))
    print("KERNEL_OK")
</pallas_src>

<mosaic_0001>
module attributes {stable_mosaic.version = 11 : i64} {
  func.func @_backbone_heads_kernel(%arg0: i32, %arg1: i32, %arg2: i32, %arg3: memref<1x64x64xbf16, #tpu.memory_space<vmem>>, %arg4: memref<64x1024xbf16, #tpu.memory_space<vmem>>, %arg5: memref<1024x128xbf16, #tpu.memory_space<vmem>>, %arg6: memref<1x1x1x128xf32, #tpu.memory_space<vmem>>, %arg7: memref<8x1024xf32, #tpu.memory_space<vmem>>) attributes {dimension_semantics = [#tpu.dimension_semantics<parallel>, #tpu.dimension_semantics<parallel>, #tpu.dimension_semantics<arbitrary>], iteration_bounds = array<i64: 2, 2, 1>, scalar_prefetch = 0 : i64, scratch_operands = 1 : i64, tpu.core_type = #tpu.core_type<tc>, window_params = [{transform_indices = @transform_0, window_bounds = array<i64: 1, 64, 64>}, {transform_indices = @transform_1, window_bounds = array<i64: 64, 1024>}, {transform_indices = @transform_2, window_bounds = array<i64: 1024, 128>}, {transform_indices = @transform_3, window_bounds = array<i64: 1, 1, 1, 128>}]} {
    %c0_i32 = arith.constant 0 : i32
    %0 = arith.cmpi eq, %arg2, %c0_i32 : i32
    %1 = arith.extui %0 : i1 to i32
    %c0_i32_0 = arith.constant 0 : i32
    %2 = arith.cmpi ne, %1, %c0_i32_0 : i32
    scf.if %2 {
      %cst_13 = arith.constant 0.000000e+00 : f32
      %17 = vector.broadcast %cst_13 : f32 to vector<8x1024xf32>
      %c0_14 = arith.constant 0 : index
      %c0_15 = arith.constant 0 : index
      %18 = vector.load %arg7[%c0_14, %c0_15] : memref<8x1024xf32, #tpu.memory_space<vmem>>, vector<8x1024xf32>
      tpu.vector_store %arg7[%c0_14, %c0_15], %17 {strides = array<i32>} : memref<8x1024xf32, #tpu.memory_space<vmem>>, vector<8x1024xf32>,
    } else {
    }
    %c0 = arith.constant 0 : index
    %c0_1 = arith.constant 0 : index
    %c0_2 = arith.constant 0 : index
    %3 = vector.load %arg3[%c0, %c0_1, %c0_2] : memref<1x64x64xbf16, #tpu.memory_space<vmem>>, vector<1x64x64xbf16>
    %4 = vector.shape_cast %3 : vector<1x64x64xbf16> to vector<64x64xbf16>
    %c0_3 = arith.constant 0 : index
    %c0_4 = arith.constant 0 : index
    %5 = vector.load %arg4[%c0_3, %c0_4] : memref<64x1024xbf16, #tpu.memory_space<vmem>>, vector<64x1024xbf16>
    %cst = arith.constant dense<0.000000e+00> : vector<64x1024xf32>
    %6 = tpu.matmul %4, %5, %cst {dimension_numbers = #tpu.dot_dimension_numbers<[1], [0], [0], [1], [0, 0, 1, 1], [], []>} : vector<64x64xbf16>, vector<64x1024xbf16>, vector<64x1024xf32> -> vector<64x1024xf32>
    %cst_5 = arith.constant 0.000000e+00 : f32
    %7 = vector.broadcast %cst_5 : f32 to vector<64x1024xf32>
    %8 = arith.maximumf %6, %7 : vector<64x1024xf32>
    %c0_6 = arith.constant 0 : index
    %c0_7 = arith.constant 0 : index
    %9 = vector.load %arg7[%c0_6, %c0_7] : memref<8x1024xf32, #tpu.memory_space<vmem>>, vector<8x1024xf32>
    %10 = vector.shape_cast %8 : vector<64x1024xf32> to vector<8x8x1024xf32>
    %cst_8 = arith.constant dense<0.000000e+00> : vector<8x1024xf32>
    %11 = vector.multi_reduction <add>, %10, %cst_8 [0] : vector<8x8x1024xf32> to vector<8x1024xf32>
    %12 = arith.addf %9, %11 : vector<8x1024xf32>
    %c0_9 = arith.constant 0 : index
    %c0_10 = arith.constant 0 : index
    %13 = vector.load %arg7[%c0_9, %c0_10] : memref<8x1024xf32, #tpu.memory_space<vmem>>, vector<8x1024xf32>
    tpu.vector_store %arg7[%c0_9, %c0_10], %12 {strides = array<i32>} : memref<8x1024xf32, #tpu.memory_space<vmem>>, vector<8x1024xf32>,
    %c0_i32_11 = arith.constant 0 : i32
    %14 = arith.cmpi eq, %arg2, %c0_i32_11 : i32
    %15 = arith.extui %14 : i1 to i32
    %c0_i32_12 = arith.constant 0 : i32
    %16 = arith.cmpi ne, %15, %c0_i32_12 : i32
    scf.if %16 {
      %c0_13 = arith.constant 0 : index
      %c0_14 = arith.constant 0 : index
      %17 = vector.load %arg7[%c0_13, %c0_14] : memref<8x1024xf32, #tpu.memory_space<vmem>>, vector<8x1024xf32>
      %cst_15 = arith.constant dense<0.000000e+00> : vector<1024xf32>
      %18 = vector.multi_reduction <add>, %17, %cst_15 [0] : vector<8x1024xf32> to vector<1024xf32>
      %19 = vector.shape_cast %18 : vector<1024xf32> to vector<1x1024xf32>
      %cst_16 = arith.constant 1.562500e-02 : f32
      %20 = vector.broadcast %cst_16 : f32 to vector<1x1024xf32>
      %21 = arith.mulf %19, %20 : vector<1x1024xf32>
      %22 = arith.truncf %21 : vector<1x1024xf32> to vector<1x1024xbf16>
      %c0_17 = arith.constant 0 : index
      %c0_18 = arith.constant 0 : index
      %23 = vector.load %arg5[%c0_17, %c0_18] : memref<1024x128xbf16, #tpu.memory_space<vmem>>, vector<1024x128xbf16>
      %cst_19 = arith.constant dense<0.000000e+00> : vector<1x128xf32>
      %24 = tpu.matmul %22, %23, %cst_19 {dimension_numbers = #tpu.dot_dimension_numbers<[1], [0], [0], [1], [0, 0, 1, 1], [], []>} : vector<1x1024xbf16>, vector<1024x128xbf16>, vector<1x128xf32> -> vector<1x128xf32>
      %c0_20 = arith.constant 0 : index
      %c0_21 = arith.constant 0 : index
      %c0_22 = arith.constant 0 : index
      %c0_23 = arith.constant 0 : index
      %25 = vector.load %arg6[%c0_20, %c0_21, %c0_22, %c0_23] : memref<1x1x1x128xf32, #tpu.memory_space<vmem>>, vector<1x1x1x128xf32>
      %26 = vector.shape_cast %25 : vector<1x1x1x128xf32> to vector<1x128xf32>
      %27 = vector.shape_cast %24 : vector<1x128xf32> to vector<1x1x1x128xf32>
      tpu.vector_store %arg6[%c0_20, %c0_21, %c0_22, %c0_23], %27 {strides = array<i32>} : memref<1x1x1x128xf32, #tpu.memory_space<vmem>>, vector<1x1x1x128xf32>,
    } else {
    }
    return
  }
  func.func @transform_0(%arg0: i32, %arg1: i32, %arg2: i32) -> (i32, i32, i32) {
    %c0_i32 = arith.constant 0 : i32
    %c0_i32_0 = arith.constant 0 : i32
    return %arg0, %arg2, %c0_i32 : i32, i32, i32
  }
  func.func @transform_1(%arg0: i32, %arg1: i32, %arg2: i32) -> (i32, i32) {
    %c0_i32 = arith.constant 0 : i32
    %c0_i32_0 = arith.constant 0 : i32
    return %c0_i32, %arg1 : i32, i32
  }
  func.func @transform_2(%arg0: i32, %arg1: i32, %arg2: i32) -> (i32, i32) {
    %c0_i32 = arith.constant 0 : i32
    %c0_i32_0 = arith.constant 0 : i32
    return %arg1, %c0_i32 : i32, i32
  }
  func.func @transform_3(%arg0: i32, %arg1: i32, %arg2: i32) -> (i32, i32, i32, i32) {
    %c0_i32 = arith.constant 0 : i32
    %c0_i32_0 = arith.constant 0 : i32
    %c0_i32_1 = arith.constant 0 : i32
    return %arg0, %arg1, %c0_i32, %c0_i32_0 : i32, i32, i32, i32
  }
}

</mosaic_0001>

<bundles_post_ra>
// kernel: st_model_forward.1
= control target key start
LH: loop header
LB: loop body
LE: loop exit
PB: predicated region body
PF: predicated region fallthrough
CT: control target
= control target key end

     0   :  { %s2304_s12 = smov 0   ;;  %s2306_s13 = smov 0   ;;  %s2648_s0 = inlined_call_operand.vmem [shape: bf16[2,64,64], index: 0, kind: input, shape index: {}]   ;;  %s2649_s1 = inlined_call_operand.vmem [shape: bf16[64,2048], index: 1, kind: input, shape index: {}]   ;;  %s2650_s2 = inlined_call_operand.vmem [shape: bf16[2048,128], index: 2, kind: input, shape index: {}]   ;;  %s2651_s3 = inlined_call_operand.vmem [shape: f32[2,2,1,128], index: 3, kind: output, shape index: {}]  }
   0x1   :  { %s2308_s14 = smov 0   ;;  %s2310_s15 = smov 0  }
   0x2   :  { %s2312_s16 = smov 0   ;;  %s2314_s17 = smov 0  }
   0x3   :  { %s2316_s18 = smov 0  }
   0x4 LB: > { %s28_s19 = sadd.s32 1, %s2273_s16  ;;  %s32_s20 = sadd.s32 1, %s2277_s17  ;;  %s2281_s18 = sphi %s2316_s18, %s13_s18   ;;  %s2277_s17 = sphi %s2314_s17, %s2657_s17   ;;  %s2273_s16 = sphi %s2312_s16, %s2656_s16   ;;  %s2269_s15 = sphi %s2310_s15, %s2655_s15   ;;  %s2265_s14 = sphi %s2308_s14, %s2654_s14   ;;  %s2261_s13 = sphi %s2306_s13, %s2653_s13   ;;  %s2257_s12 = sphi %s2304_s12, %s2652_s12  }
   0x5   : > { %p30_p0 = scmp.ge.s32.totalorder %s28_s19, 2  ;;  %s67_s21 = sadd.s32 1, %s2261_s13 }
   0x6   : > { %p74_p1 = scmp.ne.s32.totalorder %s2261_s13, %s2257_s12  ;;  %p75_p2 = scmp.eq.s32.totalorder %s2281_s18, 0 }
   0x7   : > { %s2659_s19 = smov (%p30_p0, %s28_s19), 0  ;;  %s2661_s20 = smov (!%p30_p0, %s32_s20), %s2277_s17 }
   0x8   : > { %s64_s22 = ssub.s32 %s2273_s16, %s2659_s19  ;;  %p76_p3 = por %p75_p2, %p74_p1 }
   0x9   : > { %p34_p4 = scmp.ge.s32.totalorder %s2661_s20, 2  ;;  %p65_p5 = scmp.eq.s32.totalorder %s64_s22, 0 }
   0xa   : > { %p1883_p6 = scmp.ge.s32.totalorder %s2281_s18, 4 }
   0xb   : > { %s2663_s20 = smov (%p34_p4, %s2661_s20), 0 }
   0xc   : > { %s2353_s23 = scalar_select %p65_p5, %s2261_s13, %s67_s21  }
   0xd   : > { %154 = sbr.rel (%p1883_p6) target bundleno = 38 (0x26), region = 16 }
  0x12   : > { %170 = sbr.rel (!%p76_p3) target bundleno = 38 (0x26), region = 24  ;;  %s172_s24 = sand.u32 (%p76_p3), 1, %s2261_s13  }
  0x13   : > { %s2012_s25 = sshll.u32 (%p76_p3), %s2273_s16, 5  ;;  %s1884_s26 = sshll.u32 (%p76_p3), %s172_s24, 8 }
  0x14   : > { %s2361_s29 = scalar_lea.vmem (%p76_p3), %s2649_s1, %s2012_s25  ;;  %s2366_s30 = scalar_lea.vmem (%p76_p3), [#allocation3], %s1884_s26 }
  0x15   : > { %v190_v0 = vld [vmem:[%s2361_s29] sm:$0xff] (%p76_p3)  ;;  %v192_v1 = vld [vmem:[%s2361_s29 + $0x8] sm:$0xff] (%p76_p3)  ;;  %v194_v2 = vld [vmem:[%s2361_s29 + $0x10] sm:$0xff] (%p76_p3) }
  0x16   : > { %191 = vst [vmem:[%s2366_s30] sm:$0xff] (%p76_p3), %v190_v0  ;;  %193 = vst [vmem:[%s2366_s30 + $0x8] sm:$0xff] (%p76_p3), %v192_v1  ;;  %v196_v3 = vld [vmem:[%s2361_s29 + $0x18] sm:$0xff] (%p76_p3)  ;;  %v198_v4 = vld [vmem:[%s2361_s29 + $0x40] sm:$0xff] (%p76_p3) }
  0x17   : > { %195 = vst [vmem:[%s2366_s30 + $0x10] sm:$0xff] %v194_v2  ;;  %v200_v5 = vld [vmem:[%s2361_s29 + $0x48] sm:$0xff]  ;;  %197 = vst [vmem:[%s2366_s30 + $0x18] sm:$0xff] %v196_v3  ;;  %v202_v6 = vld [vmem:[%s2361_s29 + $0x50] sm:$0xff] }
  0x18   : > { %199 = vst [vmem:[%s2366_s30 + $0x20] sm:$0xff] %v198_v4  ;;  %201 = vst [vmem:[%s2366_s30 + $0x28] sm:$0xff] %v200_v5  ;;  %v204_v7 = vld [vmem:[%s2361_s29 + $0x58] sm:$0xff]  ;;  %v206_v8 = vld [vmem:[%s2361_s29 + $0x80] sm:$0xff] }
  0x19   : > { %203 = vst [vmem:[%s2366_s30 + $0x30] sm:$0xff] %v202_v6  ;;  %205 = vst [vmem:[%s2366_s30 + $0x38] sm:$0xff] %v204_v7  ;;  %v208_v9 = vld [vmem:[%s2361_s29 + $0x88] sm:$0xff]  ;;  %v210_v10 = vld [vmem:[%s2361_s29 + $0x90] sm:$0xff] }
  0x1a   : > { %207 = vst [vmem:[%s2366_s30 + $0x40] sm:$0xff] %v206_v8  ;;  %v212_v11 = vld [vmem:[%s2361_s29 + $0x98] sm:$0xff]  ;;  %209 = vst [vmem:[%s2366_s30 + $0x48] sm:$0xff] %v208_v9  ;;  %v214_v12 = vld [vmem:[%s2361_s29 + $0xc0] sm:$0xff] }
  0x1b   : > { %211 = vst [vmem:[%s2366_s30 + $0x50] sm:$0xff] %v210_v10  ;;  %213 = vst [vmem:[%s2366_s30 + $0x58] sm:$0xff] %v212_v11  ;;  %v216_v13 = vld [vmem:[%s2361_s29 + $0xc8] sm:$0xff]  ;;  %v218_v14 = vld [vmem:[%s2361_s29 + $0xd0] sm:$0xff] }
  0x1c   : > { %215 = vst [vmem:[%s2366_s30 + $0x60] sm:$0xff] %v214_v12  ;;  %217 = vst [vmem:[%s2366_s30 + $0x68] sm:$0xff] %v216_v13  ;;  %v220_v15 = vld [vmem:[%s2361_s29 + $0xd8] sm:$0xff]  ;;  %v222_v16 = vld [vmem:[%s2361_s29 + $0x100] sm:$0xff] }
  0x1d   : > { %219 = vst [vmem:[%s2366_s30 + $0x70] sm:$0xff] %v218_v14  ;;  %v224_v17 = vld [vmem:[%s2361_s29 + $0x108] sm:$0xff]  ;;  %221 = vst [vmem:[%s2366_s30 + $0x78] sm:$0xff] %v220_v15  ;;  %v226_v18 = vld [vmem:[%s2361_s29 + $0x110] sm:$0xff] }
  0x1e   : > { %223 = vst [vmem:[%s2366_s30 + $0x80] sm:$0xff] %v222_v16  ;;  %225 = vst [vmem:[%s2366_s30 + $0x88] sm:$0xff] %v224_v17  ;;  %v228_v19 = vld [vmem:[%s2361_s29 + $0x118] sm:$0xff]  ;;  %v230_v20 = vld [vmem:[%s2361_s29 + $0x140] sm:$0xff] }
  0x1f   : > { %227 = vst [vmem:[%s2366_s30 + $0x90] sm:$0xff] %v226_v18  ;;  %229 = vst [vmem:[%s2366_s30 + $0x98] sm:$0xff] %v228_v19  ;;  %v232_v21 = vld [vmem:[%s2361_s29 + $0x148] sm:$0xff]  ;;  %v234_v22 = vld [vmem:[%s2361_s29 + $0x150] sm:$0xff] }
  0x20   : > { %231 = vst [vmem:[%s2366_s30 + $0xa0] sm:$0xff] %v230_v20  ;;  %v236_v23 = vld [vmem:[%s2361_s29 + $0x158] sm:$0xff]  ;;  %233 = vst [vmem:[%s2366_s30 + $0xa8] sm:$0xff] %v232_v21  ;;  %v238_v24 = vld [vmem:[%s2361_s29 + $0x180] sm:$0xff] }
  0x21   : > { %235 = vst [vmem:[%s2366_s30 + $0xb0] sm:$0xff] %v234_v22  ;;  %237 = vst [vmem:[%s2366_s30 + $0xb8] sm:$0xff] %v236_v23  ;;  %v240_v25 = vld [vmem:[%s2361_s29 + $0x188] sm:$0xff]  ;;  %v242_v26 = vld [vmem:[%s2361_s29 + $0x190] sm:$0xff] }
  0x22   : > { %239 = vst [vmem:[%s2366_s30 + $0xc0] sm:$0xff] %v238_v24  ;;  %241 = vst [vmem:[%s2366_s30 + $0xc8] sm:$0xff] %v240_v25  ;;  %v244_v27 = vld [vmem:[%s2361_s29 + $0x198] sm:$0xff]  ;;  %v246_v28 = vld [vmem:[%s2361_s29 + $0x1c0] sm:$0xff] }
  0x23   : > { %243 = vst [vmem:[%s2366_s30 + $0xd0] sm:$0xff] %v242_v26  ;;  %v248_v29 = vld [vmem:[%s2361_s29 + $0x1c8] sm:$0xff]  ;;  %245 = vst [vmem:[%s2366_s30 + $0xd8] sm:$0xff] %v244_v27  ;;  %v250_v30 = vld [vmem:[%s2361_s29 + $0x1d0] sm:$0xff] }
  0x24   : > { %247 = vst [vmem:[%s2366_s30 + $0xe0] sm:$0xff] %v246_v28  ;;  %249 = vst [vmem:[%s2366_s30 + $0xe8] sm:$0xff] %v248_v29  ;;  %v252_v31 = vld [vmem:[%s2361_s29 + $0x1d8] sm:$0xff] }
  0x25   : > { %251 = vst [vmem:[%s2366_s30 + $0xf0] sm:$0xff] %v250_v30  ;;  %253 = vst [vmem:[%s2366_s30 + $0xf8] sm:$0xff] %v252_v31 }
  0x26 PF: > { %p1887_p7 = scmp.ge.s32.totalorder %s2281_s18, 1  ;;  %p267_p8 = scmp.lt.s32.totalorder %s2281_s18, 5 }
  0x28   : > { %p268_p9 = pnand %p1887_p7, %p267_p8 }
  0x29   : > { %s274_s4 = sand.u32 (!%p268_p9), 1, %s2257_s12   ;;  %p314_p10 = scmp.lt.s32.totalorder (!%p268_p9), %s2269_s15, 1 }
  0x2a   : > { %271 = sbr.rel (%p268_p9) target bundleno = 545 (0x221), region = 51  ;;  %s1888_s5 = sshll.u32 (!%p268_p9), %s274_s4, 8 }
  0x2b   : > { %s2435_s6 = scalar_lea.vmem (!%p268_p9), [#allocation3], %s1888_s5  ;;  %s1891_s11 = sshll.u32 (!%p268_p9), %s2265_s14, 7 }
  0x2c   : > { %p325_p11 = scmp.lt.s32.totalorder (!%p268_p9), %s1891_s11, 255  ;;  %p332_p12 = scmp.lt.s32.totalorder (!%p268_p9), %s2265_s14, 1 }
  0x2f   : > { %v2283_v32 = vmov 0   ;;  %v382_v33 = vld [vmem:[%s2435_s6 + $0xc0] sm:$0xff]  ;;  %v383_v35 = vld [vmem:[%s2435_s6 + $0xc8] sm:$0xff]  ;;  %s2665_s15 = smov (!%p314_p10, %s2269_s15), 1  ;;  %v384_v62 = vld [vmem:[%s2435_s6 + $0xd0] sm:$0xff]  ;;  %vm570_vm0 = vcmask 523264  }
  0x30   : > { %615 = vmatprep.mubr.bf16.mxu0 %v2283_v32  ;;  %688 = vmatprep.mubr.bf16.mxu1 %v2283_v32  ;;  %v386_v34 = vld [vmem:[%s2435_s6 + $0xe0] sm:$0xff]  ;;  %v387_v37 = vld [vmem:[%s2435_s6 + $0xe8] sm:$0xff]  ;;  %s2013_s7 = sshll.u32 %s2665_s15, 5  ;;  %v388_v0 = vld [vmem:[%s2435_s6 + $0xf0] sm:$0xff]  ;;  %s2667_s11 = smov (!%p325_p11, %s1891_s11), 255 }
  0x31   : > { %v1923_v36 = vcombine.high %v382_v33, %v386_v34  ;;  %v1922_v38 = vcombine.low %v382_v33, %v386_v34  ;;  %v374_v39 = vld [vmem:[%s2435_s6 + $0x80] sm:$0xff]  ;;  %v1925_v41 = vcombine.high %v383_v35, %v387_v37  ;;  %v1924_v42 = vcombine.low %v383_v35, %v387_v37  ;;  %v375_v44 = vld [vmem:[%s2435_s6 + $0x88] sm:$0xff]  ;;  %s2456_s10 = scalar_lea.vmem %s2648_s0, %s2013_s7  ;;  %v385_v1 = vld [vmem:[%s2435_s6 + $0xd8] sm:$0xff]  ;;  %s1892_s12 = sshll.u32 %s2667_s11, 2 }
  0x32   : > { %v378_v40 = vld [vmem:[%s2435_s6 + $0xa0] sm:$0xff]  ;;  %v379_v45 = vld [vmem:[%s2435_s6 + $0xa8] sm:$0xff]  ;;  %v389_v2 = vld [vmem:[%s2435_s6 + $0xf8] sm:$0xff]  ;;  %v1927_v5 = vcombine.high %v384_v62, %v388_v0  ;;  %v1926_v10 = vcombine.low %v384_v62, %v388_v0  ;;  %s2522_s24 = scalar_lea.vmem %s2650_s2, %s1892_s12  ;;  %s2669_s14 = smov (!%p332_p12, %s2265_s14), 1 }
  0x33   : > { %v1915_v43 = vcombine.high %v374_v39, %v378_v40  ;;  %v366_v46 = vld [vmem:[%s2435_s6 + $0x40] sm:$0xff]  ;;  %591 = vmatprep.subr.bf16.mxu0 %v1923_v36  ;;  %v1917_v47 = vcombine.high %v375_v44, %v379_v45  ;;  %v367_v49 = vld [vmem:[%s2435_s6 + $0x48] sm:$0xff]  ;;  %664 = vmatprep.subr.bf16.mxu1 %v1925_v41  ;;  %v1914_v51 = vcombine.low %v374_v39, %v378_v40  ;;  %v376_v8 = vld [vmem:[%s2435_s6 + $0x90] sm:$0xff]  ;;  %s1893_s25 = sshll.u32 %s2665_s15, 1 }
  0x34   : > { %v370_v48 = vld [vmem:[%s2435_s6 + $0x60] sm:$0xff]  ;;  %v371_v50 = vld [vmem:[%s2435_s6 + $0x68] sm:$0xff]  ;;  %592 = vmatpush1.bf16.msra.mxu0 %v1922_v38  ;;  %665 = vmatpush1.bf16.msra.mxu1 %v1924_v42  ;;  %v1916_v52 = vcombine.low %v375_v44, %v379_v45  ;;  %v1929_v6 = vcombine.high %v385_v1, %v389_v2  ;;  %v380_v9 = vld [vmem:[%s2435_s6 + $0xb0] sm:$0xff]  ;;  %v1928_v13 = vcombine.low %v385_v1, %v389_v2  ;;  %s335_s26 = sadd.s32 %s1893_s25, %s2669_s14 }
  0x35   : > { %593 = vmatprep.subr.bf16.mxu0 %v1915_v43  ;;  %v1907_v53 = vcombine.high %v366_v46, %v370_v48  ;;  %666 = vmatprep.subr.bf16.mxu1 %v1917_v47  ;;  %v1909_v54 = vcombine.high %v367_v49, %v371_v50  ;;  %v358_v55 = vld [vmem:[%s2435_s6] sm:$0xff]  ;;  %v359_v57 = vld [vmem:[%s2435_s6 + $0x8] sm:$0xff]  ;;  %v1906_v59 = vcombine.low %v366_v46, %v370_v48  ;;  %v377_v11 = vld [vmem:[%s2435_s6 + $0x98] sm:$0xff]  ;;  %s336_s29 = scalar_lea.vmem %s2651_s3, %s335_s26 }
  0x36   : > { %v362_v56 = vld [vmem:[%s2435_s6 + $0x20] sm:$0xff]  ;;  %v363_v58 = vld [vmem:[%s2435_s6 + $0x28] sm:$0xff]  ;;  %v1908_v60 = vcombine.low %v367_v49, %v371_v50  ;;  %v381_v12 = vld [vmem:[%s2435_s6 + $0xb8] sm:$0xff]  ;;  %v1919_v14 = vcombine.high %v376_v8, %v380_v9  ;;  %v1918_v20 = vcombine.low %v376_v8, %v380_v9 }
  0x37   : > { %v1899_v61 = vcombine.high %v358_v55, %v362_v56  ;;  %v1901_v63 = vcombine.high %v359_v57, %v363_v58  ;;  %v1898_v3 = vcombine.low %v358_v55, %v362_v56  ;;  %v1900_v4 = vcombine.low %v359_v57, %v363_v58  ;;  %v2467_v7 = vld [vmem:[%s2456_s10] sm:$0xff]   ;;  %v368_v15 = vld [vmem:[%s2435_s6 + $0x50] sm:$0xff]  ;;  %v369_v18 = vld [vmem:[%s2435_s6 + $0x58] sm:$0xff] }
  0x38   : > { %594 = vmatpush1.bf16.msra.mxu0 %v1914_v51  ;;  %667 = vmatpush1.bf16.msra.mxu1 %v1916_v52  ;;  %v372_v16 = vld [vmem:[%s2435_s6 + $0x70] sm:$0xff]  ;;  %v1921_v17 = vcombine.high %v377_v11, %v381_v12  ;;  %v373_v19 = vld [vmem:[%s2435_s6 + $0x78] sm:$0xff]  ;;  %v1920_v21 = vcombine.low %v377_v11, %v381_v12  ;;  %v2160_v24 = vld [vmem:[%s2456_s10 + $0x8] sm:$0xff]  }
  0x39   : > { %595 = vmatprep.subr.bf16.mxu0 %v1907_v53  ;;  %668 = vmatprep.subr.bf16.mxu1 %v1909_v54  ;;  %v1911_v22 = vcombine.high %v368_v15, %v372_v16  ;;  %v1913_v23 = vcombine.high %v369_v18, %v373_v19  ;;  %v360_v25 = vld [vmem:[%s2435_s6 + $0x10] sm:$0xff]  ;;  %v361_v27 = vld [vmem:[%s2435_s6 + $0x18] sm:$0xff]  ;;  %v1910_v29 = vcombine.low %v368_v15, %v372_v16  ;;  %v2171_v45 = vld [vmem:[%s2522_s24 + $0x68] sm:$0xff]  }
  0x3a   : > { %v364_v26 = vld [vmem:[%s2435_s6 + $0x30] sm:$0xff]  ;;  %v365_v28 = vld [vmem:[%s2435_s6 + $0x38] sm:$0xff]  ;;  %v1912_v30 = vcombine.low %v369_v18, %v373_v19  ;;  %v2172_v46 = vld [vmem:[%s2522_s24 + $0xe8] sm:$0xff]  }
  0x3b   : > { %v1903_v31 = vcombine.high %v360_v25, %v364_v26  ;;  %v1905_v33 = vcombine.high %v361_v27, %v365_v28  ;;  %v1902_v34 = vcombine.low %v360_v25, %v364_v26  ;;  %v1904_v35 = vcombine.low %v361_v27, %v365_v28  ;;  %v2161_v36 = vld [vmem:[%s2456_s10 + $0x10] sm:$0xff]   ;;  %v2162_v37 = vld [vmem:[%s2456_s10 + $0x18] sm:$0xff]   ;;  %v2173_v47 = vld [vmem:[%s2522_s24 + $0x28] sm:$0xff]  }
  0x3c   : > { %596 = vmatpush1.bf16.msra.mxu0 %v1906_v59  ;;  %669 = vmatpush1.bf16.msra.mxu1 %v1908_v60  ;;  %v2164_v38 = vld [vmem:[%s2522_s24 + $0xf8] sm:$0xff]   ;;  %v2167_v41 = vld [vmem:[%s2522_s24 + $0x70] sm:$0xff]   ;;  %v2174_v48 = vld [vmem:[%s2522_s24 + $0xa8] sm:$0xff]  }
  0x3d   : > { %597 = vmatprep.subr.bf16.mxu0 %v1899_v61  ;;  %670 = vmatprep.subr.bf16.mxu1 %v1901_v63  ;;  %v2165_v39 = vld [vmem:[%s2522_s24 + $0x38] sm:$0xff]   ;;  %v2168_v42 = vld [vmem:[%s2522_s24 + $0xf0] sm:$0xff]   ;;  %v2175_v49 = vld [vmem:[%s2522_s24 + $0x60] sm:$0xff]  }
  0x3e   : > { %v2166_v40 = vld [vmem:[%s2522_s24 + $0xb8] sm:$0xff]   ;;  %v2169_v43 = vld [vmem:[%s2522_s24 + $0x30] sm:$0xff]   ;;  %v2176_v50 = vld [vmem:[%s2522_s24 + $0xe0] sm:$0xff]  }
  0x3f   : > { %v2170_v44 = vld [vmem:[%s2522_s24 + $0xb0] sm:$0xff]   ;;  %v2177_v51 = vld [vmem:[%s2522_s24 + $0x20] sm:$0xff]   ;;  %v2179_v53 = vld [vmem:[%s2522_s24 + $0x58] sm:$0xff]  }
  0x40   : > { %598 = vmatpush1.bf16.msra.mxu0 %v1898_v3  ;;  %671 = vmatpush1.bf16.msra.mxu1 %v1900_v4  ;;  %v2178_v52 = vld [vmem:[%s2522_s24 + $0xa0] sm:$0xff]   ;;  %v2180_v54 = vld [vmem:[%s2522_s24 + $0xd8] sm:$0xff]   ;;  %v2183_v57 = vld [vmem:[%s2522_s24 + $0x50] sm:$0xff]  }
  0x41   : > { %737 = vmatprep.subr.bf16.mxu0 %v1927_v5  ;;  %810 = vmatprep.subr.bf16.mxu1 %v1929_v6  ;;  %v2181_v55 = vld [vmem:[%s2522_s24 + $0x18] sm:$0xff]   ;;  %v2184_v58 = vld [vmem:[%s2522_s24 + $0xd0] sm:$0xff]   ;;  %v2187_v61 = vld [vmem:[%s2522_s24 + $0x48] sm:$0xff]  }
  0x42   : > { %v2182_v56 = vld [vmem:[%s2522_s24 + $0x98] sm:$0xff]   ;;  %v2185_v59 = vld [vmem:[%s2522_s24 + $0x10] sm:$0xff]   ;;  %v2188_v62 = vld [vmem:[%s2522_s24 + $0xc8] sm:$0xff]  }
  0x43   : > { %1930 = vmatmul.mubr.msk.bf16.vlgmr.msra.gmra.mxu0 %vm570_vm0, %v2467_v7  ;;  %1934 = vmatmul.mubr.msk.bf16.vlgmr.msra.gmra.mxu1 %vm570_vm0, %v2467_v7  ;;  %v2186_v60 = vld [vmem:[%s2522_s24 + $0x90] sm:$0xff]   ;;  %v2189_v63 = vld [vmem:[%s2522_s24 + $0x8] sm:$0xff]   ;;  %v2191_v1 = vld [vmem:[%s2522_s24 + $0x40] sm:$0xff]  }
  0x44   : > { %738 = vmatpush1.bf16.msra.mxu0 %v1926_v10  ;;  %811 = vmatpush1.bf16.msra.mxu1 %v1928_v13  ;;  %v2190_v0 = vld [vmem:[%s2522_s24 + $0x88] sm:$0xff]   ;;  %v2192_v2 = vld [vmem:[%s2522_s24 + $0xc0] sm:$0xff]   ;;  %v2195_v5 = vld [vmem:[%s2522_s24 + $0x178] sm:$0xff]  }
  0x45   : > { %625 = vmatprep.mubr.bf16.mxu0 %v2283_v32  ;;  %698 = vmatprep.mubr.bf16.mxu1 %v2283_v32  ;;  %v2193_v3 = vld [vmem:[%s2522_s24] sm:$0xff]   ;;  %v2196_v6 = vld [vmem:[%s2522_s24 + $0x1f8] sm:$0xff]  }
  0x46   : > { %739 = vmatprep.subr.bf16.mxu0 %v1919_v14  ;;  %812 = vmatprep.subr.bf16.mxu1 %v1921_v17  ;;  %v2194_v4 = vld [vmem:[%s2522_s24 + $0x80] sm:$0xff]  }
  0x48   : > { %740 = vmatpush1.bf16.msra.mxu0 %v1918_v20  ;;  %813 = vmatpush1.bf16.msra.mxu1 %v1920_v21 }
  0x49   : > { %741 = vmatprep.subr.bf16.mxu0 %v1911_v22  ;;  %814 = vmatprep.subr.bf16.mxu1 %v1913_v23 }
  0x4b   : > { %1931 = vmatmul.mubr.msk.bf16.gmra.mxu0 %vm570_vm0, %v2160_v24  ;;  %1935 = vmatmul.mubr.msk.bf16.gmra.mxu1 %vm570_vm0, %v2160_v24 }
  0x4c   : > { %635 = vmatprep.mubr.bf16.mxu0 %v2283_v32  ;;  %708 = vmatprep.mubr.bf16.mxu1 %v2283_v32 }
  0x4d   : > { %742 = vmatpush1.bf16.msra.mxu0 %v1910_v29  ;;  %815 = vmatpush1.bf16.msra.mxu1 %v1912_v30 }
  0x4e   : > { %743 = vmatprep.subr.bf16.mxu0 %v1903_v31  ;;  %816 = vmatprep.subr.bf16.mxu1 %v1905_v33 }
  0x51   : > { %744 = vmatpush1.bf16.msra.mxu0 %v1902_v34  ;;  %817 = vmatpush1.bf16.msra.mxu1 %v1904_v35 }
  0x52   : > { %2036 = vmatprep.subr.bf16.mxu1 %v2164_v38 }
  0x53   : > { %1932 = vmatmul.mubr.msk.bf16.gmra.mxu0 %vm570_vm0, %v2161_v36  ;;  %1936 = vmatmul.mubr.msk.bf16.gmra.mxu1 %vm570_vm0, %v2161_v36 }
  0x54   : > { %645 = vmatprep.mubr.bf16.mxu0 %v2283_v32  ;;  %718 = vmatprep.mubr.bf16.mxu1 %v2283_v32 }
  0x5b   : > { %1933 = vmatmul.mubr.msk.bf16.gmra.mxu0 %vm570_vm0, %v2162_v37  ;;  %1937 = vmatmul.mubr.msk.bf16.gmra.mxu1 %vm570_vm0, %v2162_v37 }
  0x5c   : > { %761 = vmatprep.mubr.bf16.mxu0 %v2283_v32  ;;  %834 = vmatprep.mubr.bf16.mxu1 %v2283_v32 }
  0x63   : > { %1938 = vmatmul.mubr.msk.bf16.vlgmr.msra.gmra.mxu0 %vm570_vm0, %v2467_v7  ;;  %1942 = vmatmul.mubr.msk.bf16.vlgmr.msra.gmra.mxu1 %vm570_vm0, %v2467_v7 }
  0x64   : > { %771 = vmatprep.mubr.bf16.mxu0 %v2283_v32  ;;  %844 = vmatprep.mubr.bf16.mxu1 %v2283_v32 }
  0x65   : > { %2037 = vmatpush3.bf16.msra.mxu1 %v2166_v40 }
  0x66   : > { %2038 = vmatprep.subr.bf16.mxu1 %v2168_v42 }
  0x69   : > { %2039 = vmatpush3.bf16.msra.mxu1 %v2170_v44 }
  0x6a   : > { %2040 = vmatprep.subr.bf16.mxu1 %v2172_v46 }
  0x6b   : > { %1939 = vmatmul.mubr.msk.bf16.gmra.mxu0 %vm570_vm0, %v2160_v24  ;;  %1943 = vmatmul.mubr.msk.bf16.gmra.mxu1 %vm570_vm0, %v2160_v24 }
  0x6c   : > { %781 = vmatprep.mubr.bf16.mxu0 %v2283_v32  ;;  %854 = vmatprep.mubr.bf16.mxu1 %v2283_v32 }
  0x6d   : > { %2041 = vmatpush3.bf16.msra.mxu1 %v2174_v48 }
  0x6e   : > { %2042 = vmatprep.subr.bf16.mxu1 %v2176_v50 }
  0x71   : > { %2043 = vmatpush3.bf16.msra.mxu1 %v2178_v52 }
  0x72   : > { %2044 = vmatprep.subr.bf16.mxu1 %v2180_v54 }
  0x73   : > { %1940 = vmatmul.mubr.msk.bf16.gmra.mxu0 %vm570_vm0, %v2161_v36  ;;  %1944 = vmatmul.mubr.msk.bf16.gmra.mxu1 %vm570_vm0, %v2161_v36 }
  0x74   : > { %791 = vmatprep.mubr.bf16.mxu0 %v2283_v32  ;;  %864 = vmatprep.mubr.bf16.mxu1 %v2283_v32  ;;  %v2163_v32 = vld [vmem:[%s2522_s24 + $0x78] sm:$0xff]  }
  0x75   : > { %2014 = vmatprep.subr.bf16.mxu0 %v2163_v32  ;;  %2045 = vmatpush3.bf16.msra.mxu1 %v2182_v56 }
  0x76   : > { %2015 = vmatpush3.bf16.msra.mxu0 %v2165_v39  ;;  %2046 = vmatprep.subr.bf16.mxu1 %v2184_v58 }
  0x77   : > { %2016 = vmatprep.subr.bf16.mxu0 %v2167_v41 }
  0x79   : > { %2047 = vmatpush3.bf16.msra.mxu1 %v2186_v60 }
  0x7a   : > { %2017 = vmatpush3.bf16.msra.mxu0 %v2169_v43  ;;  %2048 = vmatprep.subr.bf16.mxu1 %v2188_v62 }
  0x7b   : > { %1941 = vmatmul.mubr.msk.bf16.gmra.mxu0 %vm570_vm0, %v2162_v37  ;;  %1945 = vmatmul.mubr.msk.bf16.gmra.mxu1 %vm570_vm0, %v2162_v37 }
  0x7c   : > { %2018 = vmatprep.subr.bf16.mxu0 %v2171_v45 }
  0x7d   : > { %2049 = vmatpush3.bf16.msra.mxu1 %v2190_v0 }
  0x7e   : > { %2019 = vmatpush3.bf16.msra.mxu0 %v2173_v47  ;;  %2050 = vmatprep.subr.bf16.mxu1 %v2192_v2 }
  0x7f   : > { %2020 = vmatprep.subr.bf16.mxu0 %v2175_v49 }
  0x81   : > { %2051 = vmatpush3.bf16.msra.mxu1 %v2194_v4 }
  0x82   : > { %2021 = vmatpush3.bf16.msra.mxu0 %v2177_v51  ;;  %2080 = vmatprep.subr.bf16.mxu1 %v2196_v6 }
  0x83   : > { %2022 = vmatprep.subr.bf16.mxu0 %v2179_v53 }
  0x86   : > { %2023 = vmatpush3.bf16.msra.mxu0 %v2181_v55 }
  0x87   : > { %2024 = vmatprep.subr.bf16.mxu0 %v2183_v57 }
  0x8a   : > { %2025 = vmatpush3.bf16.msra.mxu0 %v2185_v59 }
  0x8b   : > { %2026 = vmatprep.subr.bf16.mxu0 %v2187_v61 }
  0x8e   : > { %2027 = vmatpush3.bf16.msra.mxu0 %v2189_v63 }
  0x8f   : > { %2028 = vmatprep.subr.bf16.mxu0 %v2191_v1 }
  0x92   : > { %2029 = vmatpush3.bf16.msra.mxu0 %v2193_v3 }
  0x93   : > { %2058 = vmatprep.subr.bf16.mxu0 %v2195_v5 }
 0x103   : > { %v617_v7 = vpop.f32.mrf.mxu0  ;;  %v690_v8 = vpop.f32.mrf.mxu1 }
 0x104   : > { %v875_v26 = vmax.f32 %v617_v7, 0.0  ;;  %v877_v30 = vmax.f32 %v690_v8, 0.0 }
 0x105   : > { %v619_v9 = vpop.f32.mrf.mxu0  ;;  %v692_v10 = vpop.f32.mrf.mxu1 }
 0x106   : > { %v876_v35 = vmax.f32 %v619_v9, 0.0  ;;  %v878_v39 = vmax.f32 %v692_v10, 0.0 }
 0x107   : > { %v621_v11 = vpop.f32.mrf.mxu0  ;;  %v694_v12 = vpop.f32.mrf.mxu1 }
 0x108   : > { %v883_v22 = vmax.f32 %v621_v11, 0.0  ;;  %v885_v24 = vmax.f32 %v694_v12, 0.0 }
 0x109   : > { %v623_v13 = vpop.f32.mrf.mxu0  ;;  %v696_v14 = vpop.f32.mrf.mxu1 }
 0x10a   : > { %v884_v27 = vmax.f32 %v623_v13, 0.0  ;;  %v886_v31 = vmax.f32 %v696_v14, 0.0  ;;  %v947_v36 = vadd.f32 %v883_v22, %v875_v26  ;;  %v961_v40 = vadd.f32 %v885_v24, %v877_v30 }
 0x10b   : > { %v627_v15 = vpop.f32.mrf.mxu0  ;;  %v700_v16 = vpop.f32.mrf.mxu1 }
 0x10c   : > { %v891_v28 = vmax.f32 %v627_v15, 0.0  ;;  %v893_v33 = vmax.f32 %v700_v16, 0.0  ;;  %v954_v44 = vadd.f32 %v884_v27, %v876_v35  ;;  %v968_v49 = vadd.f32 %v886_v31, %v878_v39 }
 0x10d   : > { %v629_v17 = vpop.f32.mrf.mxu0  ;;  %v702_v18 = vpop.f32.mrf.mxu1 }
 0x10e   : > { %v892_v37 = vmax.f32 %v629_v17, 0.0  ;;  %v894_v41 = vmax.f32 %v702_v18, 0.0  ;;  %v948_v45 = vadd.f32 %v947_v36, %v891_v28  ;;  %v962_v50 = vadd.f32 %v961_v40, %v893_v33 }
 0x10f   : > { %v631_v19 = vpop.f32.mrf.mxu0  ;;  %v704_v20 = vpop.f32.mrf.mxu1 }
 0x110   : > { %v899_v32 = vmax.f32 %v631_v19, 0.0  ;;  %v901_v42 = vmax.f32 %v704_v20, 0.0  ;;  %v955_v54 = vadd.f32 %v954_v44, %v892_v37  ;;  %v969_v59 = vadd.f32 %v968_v49, %v894_v41 }
 0x111   : > { %v633_v21 = vpop.f32.mrf.mxu0  ;;  %v706_v23 = vpop.f32.mrf.mxu1 }
 0x112   : > { %v900_v46 = vmax.f32 %v633_v21, 0.0  ;;  %v902_v51 = vmax.f32 %v706_v23, 0.0  ;;  %v949_v55 = vadd.f32 %v948_v45, %v899_v32  ;;  %v963_v60 = vadd.f32 %v962_v50, %v901_v42 }
 0x113   : > { %v637_v25 = vpop.f32.mrf.mxu0  ;;  %v710_v29 = vpop.f32.mrf.mxu1 }
 0x114   : > { %v907_v47 = vmax.f32 %v637_v25, 0.0  ;;  %v909_v52 = vmax.f32 %v710_v29, 0.0  ;;  %v956_v0 = vadd.f32 %v955_v54, %v900_v46  ;;  %v970_v5 = vadd.f32 %v969_v59, %v902_v51 }
 0x115   : > { %v639_v34 = vpop.f32.mrf.mxu0  ;;  %v712_v38 = vpop.f32.mrf.mxu1 }
 0x116   : > { %v908_v56 = vmax.f32 %v639_v34, 0.0  ;;  %v910_v61 = vmax.f32 %v712_v38, 0.0  ;;  %v950_v1 = vadd.f32 %v949_v55, %v907_v47  ;;  %v964_v6 = vadd.f32 %v963_v60, %v909_v52 }
 0x117   : > { %v641_v43 = vpop.f32.mrf.mxu0  ;;  %v714_v48 = vpop.f32.mrf.mxu1 }
 0x118   : > { %v915_v57 = vmax.f32 %v641_v43, 0.0  ;;  %v917_v62 = vmax.f32 %v714_v48, 0.0  ;;  %v957_v10 = vadd.f32 %v956_v0, %v908_v56  ;;  %v971_v14 = vadd.f32 %v970_v5, %v910_v61 }
 0x119   : > { %v643_v53 = vpop.f32.mrf.mxu0  ;;  %v716_v58 = vpop.f32.mrf.mxu1 }
 0x11a   : > { %v916_v2 = vmax.f32 %v643_v53, 0.0  ;;  %v918_v7 = vmax.f32 %v716_v58, 0.0  ;;  %v951_v11 = vadd.f32 %v950_v1, %v915_v57  ;;  %v965_v15 = vadd.f32 %v964_v6, %v917_v62 }
 0x11b   : > { %v647_v63 = vpop.f32.mrf.mxu0  ;;  %v720_v4 = vpop.f32.mrf.mxu1 }
 0x11c   : > { %v923_v3 = vmax.f32 %v647_v63, 0.0  ;;  %v925_v8 = vmax.f32 %v720_v4, 0.0  ;;  %v958_v18 = vadd.f32 %v957_v10, %v916_v2  ;;  %v972_v22 = vadd.f32 %v971_v14, %v918_v7 }
 0x11d   : > { %v649_v9 = vpop.f32.mrf.mxu0  ;;  %v722_v13 = vpop.f32.mrf.mxu1 }
 0x11e   : > { %v924_v12 = vmax.f32 %v649_v9, 0.0  ;;  %v926_v16 = vmax.f32 %v722_v13, 0.0  ;;  %v952_v19 = vadd.f32 %v951_v11, %v923_v3  ;;  %v966_v23 = vadd.f32 %v965_v15, %v925_v8 }
 0x11f   : > { %v651_v17 = vpop.f32.mrf.mxu0  ;;  %v724_v21 = vpop.f32.mrf.mxu1 }
 0x120   : > { %v931_v20 = vmax.f32 %v651_v17, 0.0  ;;  %v933_v24 = vmax.f32 %v724_v21, 0.0  ;;  %v959_v26 = vadd.f32 %v958_v18, %v924_v12  ;;  %v973_v30 = vadd.f32 %v972_v22, %v926_v16 }
 0x121   : > { %v653_v25 = vpop.f32.mrf.mxu0  ;;  %v726_v29 = vpop.f32.mrf.mxu1 }
 0x122   : > { %v953_v27 = vadd.f32 %v952_v19, %v931_v20  ;;  %v932_v28 = vmax.f32 %v653_v25, 0.0  ;;  %v967_v31 = vadd.f32 %v966_v23, %v933_v24  ;;  %v934_v33 = vmax.f32 %v726_v29, 0.0  ;;  %v2197_v25 = vld [vmem:[%s2522_s24 + $0x138] sm:$0xff]  }
 0x123   : > { %v2558_v34 = vpop.f32.mrf.mxu0  ;;  %v2560_v37 = vpop.f32.mrf.mxu1 }
 0x124   : > { %v1030_v35 = vrot.slane %v953_v27, 4  ;;  %v960_v36 = vadd.f32 %v959_v26, %v932_v28  ;;  %v1042_v32 = vrot.slane %v967_v31, 4  ;;  %v974_v38 = vadd.f32 %v973_v30, %v934_v33  ;;  %v2199_v33 = vld [vmem:[%s2522_s24 + $0x170] sm:$0xff]  }
 0x125   : > { %v2562_v39 = vpop.f32.mrf.mxu0  ;;  %v2564_v42 = vpop.f32.mrf.mxu1  ;;  %v879_v15 = vmax.f32 %v2558_v34, 0.0  ;;  %v881_v16 = vmax.f32 %v2560_v37, 0.0 }
 0x126   : > { %v1031_v40 = vadd.f32 %v1030_v35, %v953_v27  ;;  %v1036_v41 = vrot.slane %v960_v36, 4  ;;  %v1043_v43 = vadd.f32 %v1042_v32, %v967_v31  ;;  %v1048_v44 = vrot.slane %v974_v38, 4  ;;  %v2198_v31 = vld [vmem:[%s2522_s24 + $0x1b8] sm:$0xff]  }
 0x127   : > { %v767_v45 = vpop.f32.mrf.mxu0  ;;  %v840_v48 = vpop.f32.mrf.mxu1  ;;  %v880_v20 = vmax.f32 %v2562_v39, 0.0  ;;  %v882_v39 = vmax.f32 %v2564_v42, 0.0 }
 0x128   : > { %v1032_v46 = vrot.slane %v1031_v40, 2  ;;  %v1037_v47 = vadd.f32 %v1036_v41, %v960_v36  ;;  %v1044_v49 = vrot.slane %v1043_v43, 2  ;;  %v1049_v50 = vadd.f32 %v1048_v44, %v974_v38  ;;  %v2200_v38 = vld [vmem:[%s2522_s24 + $0x1f0] sm:$0xff]  }
 0x129   : > { %v769_v51 = vpop.f32.mrf.mxu0  ;;  %v2566_v54 = vpop.f32.mrf.mxu1  ;;  %v887_v12 = vmax.f32 %v767_v45, 0.0  ;;  %v889_v17 = vmax.f32 %v840_v48, 0.0 }
 0x12a   : > { %v1033_v52 = vadd.f32 %v1032_v46, %v1031_v40  ;;  %v1038_v53 = vrot.slane %v1037_v47, 2  ;;  %v1045_v55 = vadd.f32 %v1044_v49, %v1043_v43  ;;  %v1050_v56 = vrot.slane %v1049_v50, 2 }
 0x12b   : > { %v773_v57 = vpop.f32.mrf.mxu0  ;;  %v846_v60 = vpop.f32.mrf.mxu1  ;;  %v888_v21 = vmax.f32 %v769_v51, 0.0  ;;  %v890_v27 = vmax.f32 %v2566_v54, 0.0  ;;  %v975_v35 = vadd.f32 %v887_v12, %v879_v15  ;;  %v989_v40 = vadd.f32 %v889_v17, %v881_v16  ;;  %v2206_v15 = vld [vmem:[%s2522_s24 + $0x1a8] sm:$0xff]   ;;  %v2207_v16 = vld [vmem:[%s2522_s24 + $0x160] sm:$0xff]  }
 0x12c   : > { %v1034_v58 = vrot.slane %v1033_v52, 1  ;;  %v1039_v59 = vadd.f32 %v1038_v53, %v1037_v47  ;;  %v1046_v61 = vrot.slane %v1045_v55, 1  ;;  %v1051_v62 = vadd.f32 %v1050_v56, %v1049_v50  ;;  %v2201_v50 = vld [vmem:[%s2522_s24 + $0x130] sm:$0xff]   ;;  %v2203_v56 = vld [vmem:[%s2522_s24 + $0x168] sm:$0xff]  }
 0x12d   : > { %v2568_v63 = vpop.f32.mrf.mxu0  ;;  %v2570_v1 = vpop.f32.mrf.mxu1  ;;  %v895_v22 = vmax.f32 %v773_v57, 0.0  ;;  %v897_v28 = vmax.f32 %v846_v60, 0.0  ;;  %v982_v45 = vadd.f32 %v888_v21, %v880_v20  ;;  %v996_v42 = vadd.f32 %v890_v27, %v882_v39  ;;  %v2208_v21 = vld [vmem:[%s2522_s24 + $0x1e0] sm:$0xff]  }
 0x12e   : > { %v1035_v0 = vadd.f32 %v1034_v58, %v1033_v52  ;;  %v1040_v2 = vrot.slane %v1039_v59, 1  ;;  %v1047_v3 = vadd.f32 %v1046_v61, %v1045_v55  ;;  %v1052_v5 = vrot.slane %v1051_v62, 1  ;;  %v2202_v55 = vld [vmem:[%s2522_s24 + $0x1b0] sm:$0xff]  }
 0x12f   : > { %v777_v4 = vpop.f32.mrf.mxu0  ;;  %v2572_v6 = vpop.f32.mrf.mxu1  ;;  %v896_v36 = vmax.f32 %v2568_v63, 0.0  ;;  %v898_v41 = vmax.f32 %v2570_v1, 0.0  ;;  %v976_v46 = vadd.f32 %v975_v35, %v895_v22  ;;  %v990_v51 = vadd.f32 %v989_v40, %v897_v28 }
 0x130   : > { %v1041_v7 = vadd.f32 %v1040_v2, %v1039_v59  ;;  %v1078_v8 = vmul.f32 0.015625, %v1035_v0  ;;  %v1053_v10 = vadd.f32 %v1052_v5, %v1051_v62  ;;  %v1080_v11 = vmul.f32 0.015625, %v1047_v3  ;;  %v2204_v62 = vld [vmem:[%s2522_s24 + $0x1e8] sm:$0xff]  }
 0x131   : > { %v2574_v9 = vpop.f32.mrf.mxu0  ;;  %v2576_v13 = vpop.f32.mrf.mxu1  ;;  %v903_v37 = vmax.f32 %v777_v4, 0.0  ;;  %v905_v43 = vmax.f32 %v2572_v6, 0.0  ;;  %v983_v57 = vadd.f32 %v982_v45, %v896_v36  ;;  %v997_v63 = vadd.f32 %v996_v42, %v898_v41  ;;  %v2210_v36 = vld [vmem:[%s2522_s24 + $0x1a0] sm:$0xff]   ;;  %v2212_v41 = vld [vmem:[%s2522_s24 + $0x1d8] sm:$0xff]  }
 0x132   : > { %v1079_v14 = vmul.f32 0.015625, %v1041_v7  ;;  %v1081_v19 = vmul.f32 0.015625, %v1053_v10  ;;  %v1086_v26 = vpack.c.bf16 %v1078_v8, %v1078_v8  ;;  %v1088_v34 = vpack.c.bf16 %v1080_v11, %v1080_v11  ;;  %v2214_v42 = vld [vmem:[%s2522_s24 + $0x198] sm:$0xff]  }
 0x133   : > { %v783_v18 = vpop.f32.mrf.mxu0  ;;  %v856_v23 = vpop.f32.mrf.mxu1  ;;  %v904_v47 = vmax.f32 %v2574_v9, 0.0  ;;  %v906_v52 = vmax.f32 %v2576_v13, 0.0  ;;  %v977_v58 = vadd.f32 %v976_v46, %v903_v37  ;;  %v991_v0 = vadd.f32 %v990_v51, %v905_v43  ;;  %v2205_v9 = vld [vmem:[%s2522_s24 + $0x128] sm:$0xff]   ;;  %v2211_v37 = vld [vmem:[%s2522_s24 + $0x158] sm:$0xff]   ;;  %v2215_v51 = vld [vmem:[%s2522_s24 + $0x150] sm:$0xff]  }
 0x134   : > { %v1087_v24 = vpack.c.bf16 %v1079_v14, %v1079_v14  ;;  %v1089_v30 = vpack.c.bf16 %v1081_v19, %v1081_v19  ;;  %v911_v48 = vmax.f32 %v783_v18, 0.0  ;;  %v913_v53 = vmax.f32 %v856_v23, 0.0 }
 0x135   : > { %v2583_v29 = vpop.f32.mrf.mxu0  ;;  %v858_v32 = vpop.f32.mrf.mxu1  ;;  %v984_v4 = vadd.f32 %v983_v57, %v904_v47  ;;  %v998_v10 = vadd.f32 %v997_v63, %v906_v52  ;;  %v2219_v63 = vld [vmem:[%s2522_s24 + $0x148] sm:$0xff]  }
 0x136   : > { %1638 = vmatprep.mubr.bf16.mxu0 %v1087_v24  ;;  %1678 = vmatprep.mubr.bf16.mxu1 %v1089_v30  ;;  %v912_v59 = vmax.f32 %v2583_v29, 0.0  ;;  %v914_v1 = vmax.f32 %v858_v32, 0.0  ;;  %v978_v5 = vadd.f32 %v977_v58, %v911_v48  ;;  %v992_v11 = vadd.f32 %v991_v0, %v913_v53  ;;  %v2209_v30 = vld [vmem:[%s2522_s24 + $0x120] sm:$0xff]   ;;  %v2213_v48 = vld [vmem:[%s2522_s24 + $0x118] sm:$0xff]  }
 0x137   : > { %v787_v44 = vpop.f32.mrf.mxu0  ;;  %1639 = vmatmul.mubr.bf16.vlgmr.msra.gmra.mxu0 %v1086_v26  ;;  %v860_v49 = vpop.f32.mrf.mxu1  ;;  %1679 = vmatmul.mubr.bf16.vlgmr.msra.gmra.mxu1 %v1088_v34 }
 0x138   : > { %2059 = vmatpush3.bf16.msra.mxu0 %v2197_v25  ;;  %2081 = vmatpush3.bf16.msra.mxu1 %v2198_v31  ;;  %v919_v60 = vmax.f32 %v787_v44, 0.0  ;;  %v921_v2 = vmax.f32 %v860_v49, 0.0  ;;  %v985_v17 = vadd.f32 %v984_v4, %v912_v59  ;;  %v999_v22 = vadd.f32 %v998_v10, %v914_v1  ;;  %v2217_v59 = vld [vmem:[%s2522_s24 + $0x110] sm:$0xff]   ;;  %v2222_v10 = vld [vmem:[%s2522_s24 + $0x188] sm:$0xff]  }
 0x139   : > { %v789_v54 = vpop.f32.mrf.mxu0  ;;  %2060 = vmatprep.subr.bf16.mxu0 %v2199_v33  ;;  %v862_v61 = vpop.f32.mrf.mxu1  ;;  %2082 = vmatprep.subr.bf16.mxu1 %v2200_v38 }
 0x13a   : > { %v920_v6 = vmax.f32 %v789_v54, 0.0  ;;  %v922_v12 = vmax.f32 %v862_v61, 0.0  ;;  %v979_v18 = vadd.f32 %v978_v5, %v919_v60  ;;  %v993_v23 = vadd.f32 %v992_v11, %v921_v2  ;;  %v2216_v54 = vld [vmem:[%s2522_s24 + $0x1d0] sm:$0xff]   ;;  %v2220_v2 = vld [vmem:[%s2522_s24 + $0x1c8] sm:$0xff]   ;;  %v2223_v11 = vld [vmem:[%s2522_s24 + $0x140] sm:$0xff]  }
 0x13b   : > { %v793_v3 = vpop.f32.mrf.mxu0  ;;  %v866_v8 = vpop.f32.mrf.mxu1 }
 0x13c   : > { %v927_v7 = vmax.f32 %v793_v3, 0.0  ;;  %2061 = vmatpush3.bf16.msra.mxu0 %v2201_v50  ;;  %v929_v13 = vmax.f32 %v866_v8, 0.0  ;;  %2083 = vmatpush3.bf16.msra.mxu1 %v2202_v55  ;;  %v986_v26 = vadd.f32 %v985_v17, %v920_v6  ;;  %v1000_v31 = vadd.f32 %v999_v22, %v922_v12  ;;  %v2224_v12 = vld [vmem:[%s2522_s24 + $0x1c0] sm:$0xff]  }
 0x13d   : > { %v795_v14 = vpop.f32.mrf.mxu0  ;;  %2062 = vmatprep.subr.bf16.mxu0 %v2203_v56  ;;  %v868_v20 = vpop.f32.mrf.mxu1  ;;  %2084 = vmatprep.subr.bf16.mxu1 %v2204_v62  ;;  %v2218_v62 = vld [vmem:[%s2522_s24 + $0x190] sm:$0xff]   ;;  %v2225_v17 = vld [vmem:[%s2522_s24 + $0x100] sm:$0xff]  }
 0x13e   : > { %v928_v19 = vmax.f32 %v795_v14, 0.0  ;;  %v930_v24 = vmax.f32 %v868_v20, 0.0  ;;  %v980_v27 = vadd.f32 %v979_v18, %v927_v7  ;;  %v994_v33 = vadd.f32 %v993_v23, %v929_v13  ;;  %v2221_v7 = vld [vmem:[%s2522_s24 + $0x108] sm:$0xff]  }
 0x13f   : > { %v797_v25 = vpop.f32.mrf.mxu0  ;;  %v870_v29 = vpop.f32.mrf.mxu1 }
 0x140   : > { %v935_v28 = vmax.f32 %v797_v25, 0.0  ;;  %2063 = vmatpush3.bf16.msra.mxu0 %v2205_v9  ;;  %v937_v34 = vmax.f32 %v870_v29, 0.0  ;;  %2085 = vmatpush3.bf16.msra.mxu1 %v2206_v15  ;;  %v987_v32 = vadd.f32 %v986_v26, %v928_v19  ;;  %v1001_v43 = vadd.f32 %v1000_v31, %v930_v24  ;;  %v2226_v19 = vld [vmem:[%s2522_s24 + $0x180] sm:$0xff]  }
 0x141   : > { %v799_v35 = vpop.f32.mrf.mxu0  ;;  %2064 = vmatprep.subr.bf16.mxu0 %v2207_v16  ;;  %v872_v40 = vpop.f32.mrf.mxu1  ;;  %2086 = vmatprep.subr.bf16.mxu1 %v2208_v21 }
 0x142   : > { %v981_v38 = vadd.f32 %v980_v27, %v935_v28  ;;  %v936_v39 = vmax.f32 %v799_v35, 0.0  ;;  %v995_v44 = vadd.f32 %v994_v33, %v937_v34  ;;  %v938_v45 = vmax.f32 %v872_v40, 0.0 }
 0x144   : > { %v1054_v46 = vrot.slane %v981_v38, 4  ;;  %v988_v47 = vadd.f32 %v987_v32, %v936_v39  ;;  %2065 = vmatpush3.bf16.msra.mxu0 %v2209_v30  ;;  %v1066_v49 = vrot.slane %v995_v44, 4  ;;  %v1002_v50 = vadd.f32 %v1001_v43, %v938_v45  ;;  %2087 = vmatpush3.bf16.msra.mxu1 %v2210_v36 }
 0x145   : > { %2066 = vmatprep.subr.bf16.mxu0 %v2211_v37  ;;  %2088 = vmatprep.subr.bf16.mxu1 %v2212_v41 }
 0x146   : > { %v1055_v52 = vadd.f32 %v1054_v46, %v981_v38  ;;  %v1060_v53 = vrot.slane %v988_v47, 4  ;;  %v1067_v55 = vadd.f32 %v1066_v49, %v995_v44  ;;  %v1072_v56 = vrot.slane %v1002_v50, 4 }
 0x148   : > { %v1056_v57 = vrot.slane %v1055_v52, 2  ;;  %v1061_v58 = vadd.f32 %v1060_v53, %v988_v47  ;;  %2067 = vmatpush3.bf16.msra.mxu0 %v2213_v48  ;;  %v1068_v60 = vrot.slane %v1067_v55, 2  ;;  %v1073_v61 = vadd.f32 %v1072_v56, %v1002_v50  ;;  %2089 = vmatpush3.bf16.msra.mxu1 %v2214_v42 }
 0x149   : > { %2068 = vmatprep.subr.bf16.mxu0 %v2215_v51  ;;  %2090 = vmatprep.subr.bf16.mxu1 %v2216_v54 }
 0x14a   : > { %v1057_v0 = vadd.f32 %v1056_v57, %v1055_v52  ;;  %v1062_v1 = vrot.slane %v1061_v58, 2  ;;  %v1069_v3 = vadd.f32 %v1068_v60, %v1067_v55  ;;  %v1074_v4 = vrot.slane %v1073_v61, 2 }
 0x14c   : > { %v1058_v5 = vrot.slane %v1057_v0, 1  ;;  %v1063_v6 = vadd.f32 %v1062_v1, %v1061_v58  ;;  %2069 = vmatpush3.bf16.msra.mxu0 %v2217_v59  ;;  %v1070_v8 = vrot.slane %v1069_v3, 1  ;;  %v1075_v9 = vadd.f32 %v1074_v4, %v1073_v61  ;;  %2091 = vmatpush3.bf16.msra.mxu1 %v2218_v62 }
 0x14d   : > { %2070 = vmatprep.subr.bf16.mxu0 %v2219_v63  ;;  %2092 = vmatprep.subr.bf16.mxu1 %v2220_v2 }
 0x14e   : > { %v1064_v13 = vrot.slane %v1063_v6, 1  ;;  %v1059_v14 = vadd.f32 %v1058_v5, %v1057_v0  ;;  %v1076_v15 = vrot.slane %v1075_v9, 1  ;;  %v1071_v16 = vadd.f32 %v1070_v8, %v1069_v3 }
 0x150   : > { %2071 = vmatpush3.bf16.msra.mxu0 %v2221_v7  ;;  %v1065_v18 = vadd.f32 %v1064_v13, %v1063_v6  ;;  %2093 = vmatpush3.bf16.msra.mxu1 %v2222_v10  ;;  %v1077_v20 = vadd.f32 %v1076_v15, %v1075_v9  ;;  %v1082_v21 = vmul.f32 0.015625, %v1059_v14  ;;  %v1084_v23 = vmul.f32 0.015625, %v1071_v16 }
 0x151   : > { %2072 = vmatprep.subr.bf16.mxu0 %v2223_v11  ;;  %2094 = vmatprep.subr.bf16.mxu1 %v2224_v12 }
 0x152   : > { %v1083_v22 = vmul.f32 0.015625, %v1065_v18  ;;  %v1085_v24 = vmul.f32 0.015625, %v1077_v20  ;;  %v1090_v27 = vpack.c.bf16 %v1082_v21, %v1082_v21  ;;  %v1092_v28 = vpack.c.bf16 %v1084_v23, %v1084_v23 }
 0x154   : > { %2073 = vmatpush3.bf16.msra.mxu0 %v2225_v17  ;;  %v1091_v25 = vpack.c.bf16 %v1083_v22, %v1083_v22  ;;  %2095 = vmatpush3.bf16.msra.mxu1 %v2226_v19  ;;  %v1093_v26 = vpack.c.bf16 %v1085_v24, %v1085_v24 }
 0x156   : > { %1718 = vmatprep.mubr.bf16.mxu0 %v1091_v25  ;;  %1758 = vmatprep.mubr.bf16.mxu1 %v1093_v26 }
 0x157   : > { %1719 = vmatmul.mubr.bf16.vlgmr.msra.gmra.mxu0 %v1090_v27  ;;  %1759 = vmatmul.mubr.bf16.vlgmr.msra.gmra.mxu1 %v1092_v28 }
 0x1f7   : > { %v2030_v29 = vpop.f32.mrf.mxu0  ;;  %v2052_v30 = vpop.f32.mrf.mxu1 }
 0x1f9   : > { %v2031_v31 = vpop.f32.mrf.mxu0  ;;  %v2053_v33 = vpop.f32.mrf.mxu1 }
 0x1fa   : > { %v2032_v32 = vadd.f32 %v2031_v31, %v2030_v29  ;;  %v2054_v38 = vadd.f32 %v2053_v33, %v2052_v30 }
 0x1fb   : > { %v2033_v34 = vpop.f32.mrf.mxu0  ;;  %v2055_v35 = vpop.f32.mrf.mxu1 }
 0x1fc   : > { %v1681_v43 = vadd.f32 %v2054_v38, %v2032_v32 }
 0x1fd   : > { %v2034_v36 = vpop.f32.mrf.mxu0  ;;  %v2056_v37 = vpop.f32.mrf.mxu1 }
 0x217   : > { %v2074_v39 = vpop.f32.mrf.mxu0  ;;  %v2096_v40 = vpop.f32.mrf.mxu1 }
 0x219   : > { %v2075_v41 = vpop.f32.mrf.mxu0  ;;  %v2097_v45 = vpop.f32.mrf.mxu1 }
 0x21a   : > { %v2076_v44 = vadd.f32 %v2075_v41, %v2074_v39  ;;  %v2098_v48 = vadd.f32 %v2097_v45, %v2096_v40 }
 0x21b   : > { %v2077_v46 = vpop.f32.mrf.mxu0  ;;  %v2099_v49 = vpop.f32.mrf.mxu1 }
 0x21c   : > { %v1721_v47 = vadd.f32 %v2076_v44, %v1681_v43 }
 0x21d   : > { %v2078_v50 = vpop.f32.mrf.mxu0  ;;  %v2100_v51 = vpop.f32.mrf.mxu1 }
 0x21e   : > { %v1761_v42 = vadd.f32 %v2098_v48, %v1721_v47 }
 0x220   : > { %1766 = vst [vmem:[%s336_s29] sm:$0x1] %v1761_v42 }
 0x221 PF: > { %s13_s18 = sadd.s32 1, %s2281_s18   ;;  %s2652_s12 = smov %s2261_s13 }
 0x222   : > { %p10_p13 = scmp.ge.s32.totalorder %s13_s18, 6   ;;  %s2653_s13 = smov %s2353_s23 }
 0x223   : > { %s2654_s14 = smov %s2273_s16  ;;  %s2655_s15 = smov %s2277_s17 }
 0x224   : > { %s2656_s16 = smov %s2659_s19  ;;  %s2657_s17 = smov %s2663_s20 }
 0x225   :  { %12 = sbr.rel (!%p10_p13) target bundleno = 4 (0x4), region = 104 }

</bundles_post_ra>
